<compile_context>
chip_gen: v7x
topology: tpu7x:2x2x1
jax: 0.10.0
libtpu: 0.0.40
codegen_flags: <defaults>
</compile_context>

<pallas_src>
import jax
import jax.numpy as jnp
from jax.experimental import pallas as pl
from jax.experimental.pallas import tpu as pltpu

_NEG_SLOPE = 0.01  # F.leaky_relu default negative_slope
_IN_F, _HID_F, _OUT_F = 24, 12, 4


def _policy_kernel(x_ref, w1_ref, b1_ref, w2_ref, b2_ref, o_ref):
    # Transposed, lane-dense layout (batch on the lane axis):
    #   x_ref : (24, Bt)    w1_ref: (12, 24)   b1_ref: (12, 1)
    #   w2_ref: (4, 12)     b2_ref: (4, 1)     o_ref : (4, Bt)
    # fc1: w1 @ x + b1
    h = jnp.dot(w1_ref[...], x_ref[...], preferred_element_type=jnp.float32)
    h = h + b1_ref[...]
    # LeakyReLU (negative_slope = 0.01)
    h = jnp.where(h > 0, h, _NEG_SLOPE * h)
    # fc2: w2 @ h + b2
    y = jnp.dot(w2_ref[...], h, preferred_element_type=jnp.float32)
    y = y + b2_ref[...]
    # tanh -> lane-dense (4, Bt) store
    o_ref[...] = jnp.tanh(y).astype(o_ref.dtype)


def policy_forward(x, w1, b1, w2, b2, *, block_b=2048):
    """Forward pass of _Policy.

    x : (B, 24) float32
    w1: (12, 24), b1: (12,)   -- torch nn.Linear (out_features, in_features)
    w2: (4, 12),  b2: (4,)
    returns (B, 4) float32
    """
    B = x.shape[0]

    # Lane-block size: multiple of 128, capped at block_b, no bigger than
    # the (padded) batch itself.
    bt = min(block_b, max(128, pl.cdiv(B, 128) * 128))
    b_pad = pl.cdiv(B, bt) * bt

    # Wrapper-side layout plumbing: batch onto the lane axis, pad to a
    # multiple of the block size (padded columns are computed then sliced
    # away; the MLP is pointwise per-column so this is safe).
    xt = jnp.zeros((_IN_F, b_pad), x.dtype).at[:, :B].set(x.T)
    b1c = b1.reshape(_HID_F, 1).astype(jnp.float32)
    b2c = b2.reshape(_OUT_F, 1).astype(jnp.float32)

    out_t = pl.pallas_call(
        _policy_kernel,
        out_shape=jax.ShapeDtypeStruct((_OUT_F, b_pad), jnp.float32),
        grid_spec=pltpu.PrefetchScalarGridSpec(
            num_scalar_prefetch=0,
            grid=(b_pad // bt,),
            in_specs=[
                pl.BlockSpec((_IN_F, bt), lambda i: (0, i)),       # x tile
                pl.BlockSpec((_HID_F, _IN_F), lambda i: (0, 0)),   # w1 (resident)
                pl.BlockSpec((_HID_F, 1), lambda i: (0, 0)),       # b1 (resident)
                pl.BlockSpec((_OUT_F, _HID_F), lambda i: (0, 0)),  # w2 (resident)
                pl.BlockSpec((_OUT_F, 1), lambda i: (0, 0)),       # b2 (resident)
            ],
            out_specs=pl.BlockSpec((_OUT_F, bt), lambda i: (0, i)),
        ),
        compiler_params=pltpu.CompilerParams(
            # batch axis is embarrassingly parallel -> megacore on v7x
            dimension_semantics=("parallel",),
        ),
    )(xt, w1.astype(jnp.float32), b1c, w2.astype(jnp.float32), b2c)

    return out_t[:, :B].T


def init_params(key):
    """nn.Linear-style init: uniform in [-1/sqrt(fan_in), 1/sqrt(fan_in)],
    weights stored in torch (out_features, in_features) layout."""
    k1, k2, k3, k4 = jax.random.split(key, 4)
    bound1 = 1.0 / jnp.sqrt(float(_IN_F))
    bound2 = 1.0 / jnp.sqrt(float(_HID_F))
    w1 = jax.random.uniform(k1, (_HID_F, _IN_F), jnp.float32, -bound1, bound1)
    b1 = jax.random.uniform(k2, (_HID_F,), jnp.float32, -bound1, bound1)
    w2 = jax.random.uniform(k3, (_OUT_F, _HID_F), jnp.float32, -bound2, bound2)
    b2 = jax.random.uniform(k4, (_OUT_F,), jnp.float32, -bound2, bound2)
    return w1, b1, w2, b2


def _ref_forward(x, w1, b1, w2, b2):
    h = x @ w1.T + b1
    h = jnp.where(h > 0, h, _NEG_SLOPE * h)
    y = h @ w2.T + b2
    return jnp.tanh(y)


if __name__ == "__main__":
    key = jax.random.PRNGKey(0)
    k_params, k_x = jax.random.split(key)
    w1, b1, w2, b2 = init_params(k_params)

    B = 8  # tiny smoke-test batch; kernel pads to one 128-lane block
    x = jax.random.normal(k_x, (B, _IN_F), jnp.float32)

    out = policy_forward(x, w1, b1, w2, b2)
    out = jax.block_until_ready(out)

    ref = _ref_forward(x, w1, b1, w2, b2)
    assert out.shape == (B, _OUT_F)
    assert jnp.allclose(out, ref, atol=1e-5, rtol=1e-5)

    print("KERNEL_OK")
</pallas_src>

<mosaic_0001>
module attributes {stable_mosaic.version = 11 : i64} {
  func.func @_policy_kernel(%arg0: i32, %arg1: memref<24x128xf32, #tpu.memory_space<vmem>>, %arg2: memref<12x24xf32, #tpu.memory_space<vmem>>, %arg3: memref<12x1xf32, #tpu.memory_space<vmem>>, %arg4: memref<4x12xf32, #tpu.memory_space<vmem>>, %arg5: memref<4x1xf32, #tpu.memory_space<vmem>>, %arg6: memref<4x128xf32, #tpu.memory_space<vmem>>) attributes {dimension_semantics = [#tpu.dimension_semantics<parallel>], iteration_bounds = array<i64: 1>, scalar_prefetch = 0 : i64, scratch_operands = 0 : i64, tpu.core_type = #tpu.core_type<tc>, window_params = [{transform_indices = @transform_0, window_bounds = array<i64: 24, 128>}, {pipeline_mode = #tpu.pipeline_mode<synchronous>, transform_indices = @transform_1, window_bounds = array<i64: 12, 24>}, {pipeline_mode = #tpu.pipeline_mode<synchronous>, transform_indices = @transform_2, window_bounds = array<i64: 12, 1>}, {pipeline_mode = #tpu.pipeline_mode<synchronous>, transform_indices = @transform_3, window_bounds = array<i64: 4, 12>}, {pipeline_mode = #tpu.pipeline_mode<synchronous>, transform_indices = @transform_4, window_bounds = array<i64: 4, 1>}, {transform_indices = @transform_5, window_bounds = array<i64: 4, 128>}]} {
    %c0 = arith.constant 0 : index
    %c0_0 = arith.constant 0 : index
    %0 = vector.load %arg2[%c0, %c0_0] : memref<12x24xf32, #tpu.memory_space<vmem>>, vector<12x24xf32>
    %c0_1 = arith.constant 0 : index
    %c0_2 = arith.constant 0 : index
    %1 = vector.load %arg1[%c0_1, %c0_2] : memref<24x128xf32, #tpu.memory_space<vmem>>, vector<24x128xf32>
    %cst = arith.constant dense<0.000000e+00> : vector<12x128xf32>
    %2 = tpu.matmul %0, %1, %cst {dimension_numbers = #tpu.dot_dimension_numbers<[1], [0], [0], [1], [0, 0, 1, 1], [], []>} : vector<12x24xf32>, vector<24x128xf32>, vector<12x128xf32> -> vector<12x128xf32>
    %c0_3 = arith.constant 0 : index
    %c0_4 = arith.constant 0 : index
    %3 = vector.load %arg3[%c0_3, %c0_4] : memref<12x1xf32, #tpu.memory_space<vmem>>, vector<12x1xf32>
    %4 = vector.broadcast %3 : vector<12x1xf32> to vector<12x128xf32>
    %5 = arith.addf %2, %4 : vector<12x128xf32>
    %cst_5 = arith.constant 0.000000e+00 : f32
    %6 = vector.broadcast %cst_5 : f32 to vector<12x128xf32>
    %7 = arith.cmpf ogt, %5, %6 : vector<12x128xf32>
    %cst_6 = arith.constant 0.00999999977 : f32
    %8 = vector.broadcast %cst_6 : f32 to vector<12x128xf32>
    %9 = arith.mulf %8, %5 : vector<12x128xf32>
    %10 = arith.select %7, %5, %9 : vector<12x128xi1>, vector<12x128xf32>
    %c0_7 = arith.constant 0 : index
    %c0_8 = arith.constant 0 : index
    %11 = vector.load %arg4[%c0_7, %c0_8] : memref<4x12xf32, #tpu.memory_space<vmem>>, vector<4x12xf32>
    %cst_9 = arith.constant dense<0.000000e+00> : vector<4x128xf32>
    %12 = tpu.matmul %11, %10, %cst_9 {dimension_numbers = #tpu.dot_dimension_numbers<[1], [0], [0], [1], [0, 0, 1, 1], [], []>} : vector<4x12xf32>, vector<12x128xf32>, vector<4x128xf32> -> vector<4x128xf32>
    %c0_10 = arith.constant 0 : index
    %c0_11 = arith.constant 0 : index
    %13 = vector.load %arg5[%c0_10, %c0_11] : memref<4x1xf32, #tpu.memory_space<vmem>>, vector<4x1xf32>
    %14 = vector.broadcast %13 : vector<4x1xf32> to vector<4x128xf32>
    %15 = arith.addf %12, %14 : vector<4x128xf32>
    %16 = math.tanh %15 : vector<4x128xf32>
    %c0_12 = arith.constant 0 : index
    %c0_13 = arith.constant 0 : index
    %17 = vector.load %arg6[%c0_12, %c0_13] : memref<4x128xf32, #tpu.memory_space<vmem>>, vector<4x128xf32>
    tpu.vector_store %arg6[%c0_12, %c0_13], %16 {strides = array<i32>} : memref<4x128xf32, #tpu.memory_space<vmem>>, vector<4x128xf32>,
    return
  }
  func.func @transform_0(%arg0: i32) -> (i32, i32) {
    %c0_i32 = arith.constant 0 : i32
    %c0_i32_0 = arith.constant 0 : i32
    return %c0_i32, %arg0 : i32, i32
  }
  func.func @transform_1(%arg0: i32) -> (i32, i32) {
    %c0_i32 = arith.constant 0 : i32
    %c0_i32_0 = arith.constant 0 : i32
    %c0_i32_1 = arith.constant 0 : i32
    return %c0_i32, %c0_i32_0 : i32, i32
  }
  func.func @transform_2(%arg0: i32) -> (i32, i32) {
    %c0_i32 = arith.constant 0 : i32
    %c0_i32_0 = arith.constant 0 : i32
    %c0_i32_1 = arith.constant 0 : i32
    return %c0_i32, %c0_i32_0 : i32, i32
  }
  func.func @transform_3(%arg0: i32) -> (i32, i32) {
    %c0_i32 = arith.constant 0 : i32
    %c0_i32_0 = arith.constant 0 : i32
    %c0_i32_1 = arith.constant 0 : i32
    return %c0_i32, %c0_i32_0 : i32, i32
  }
  func.func @transform_4(%arg0: i32) -> (i32, i32) {
    %c0_i32 = arith.constant 0 : i32
    %c0_i32_0 = arith.constant 0 : i32
    %c0_i32_1 = arith.constant 0 : i32
    return %c0_i32, %c0_i32_0 : i32, i32
  }
  func.func @transform_5(%arg0: i32) -> (i32, i32) {
    %c0_i32 = arith.constant 0 : i32
    %c0_i32_0 = arith.constant 0 : i32
    return %c0_i32, %arg0 : i32, i32
  }
}

</mosaic_0001>

<bundles_post_ra>
// kernel: tpu_custom_call.1
= control target key start
LH: loop header
LB: loop body
LE: loop exit
PB: predicated region body
PF: predicated region fallthrough
CT: control target
= control target key end

     0   :  { %10 = vsyncpa [#allocation3], 0  ;;  %s422_s0 = inlined_call_operand.hbm [shape: f32[24,128], index: 0, kind: input, shape index: {}]   ;;  %s423_s1 = inlined_call_operand.vmem [shape: f32[12,24], index: 1, kind: input, shape index: {}]   ;;  %s424_s2 = inlined_call_operand.vmem [shape: f32[12,1], index: 2, kind: input, shape index: {}]   ;;  %s425_s3 = inlined_call_operand.vmem [shape: f32[4,12], index: 3, kind: input, shape index: {}]   ;;  %s426_s4 = inlined_call_operand.vmem [shape: f32[4,1], index: 4, kind: input, shape index: {}]   ;;  %s427_s5 = inlined_call_operand.hbm [shape: f32[4,128], index: 5, kind: output, shape index: {}]  }
   0x1   :  { %11 = vsyncpa [#allocation4], 0  ;;  %s339_s18 = smov [#allocation2]   ;;  %s291_s22 = scalar_lea.hbm %s422_s0, 384 }
   0x2   :  { %s17_s19 = sshll.u32 %s339_s18, 4  ;;  %p292_p0 = scmp.ne.s32.totalorder %s422_s0, %s291_s22  ;;  %s18_s19 = int_to_ptr.vmem [resolvable:$true] %s17_s19 }
   0x3   :  { %p295_p1 = scmp.lt.u32.totalorder %s291_s22, %s422_s0 }
   0x5   :  { %p297_p2 = pnand %p295_p1, %p292_p0 }
   0x7   :  { %300 = shalt.err (!%p297_p2)
}
   0x8   :  { %s301_s27 = scalar_lea.vmem %s18_s19, 384  ;;  %p306_p4 = scmp.lt.s32.totalorder %s18_s19, %s18_s19 }
   0x9   :  { %p302_p3 = scmp.ne.s32.totalorder %s18_s19, %s301_s27  ;;  %p307_p5 = scmp.lt.s32.totalorder %s301_s27, %s301_s27 }
   0xb   :  { %p308_p6 = por %p307_p5, %p306_p4 }
   0xd   :  { %p309_p7 = pnand %p308_p6, %p302_p3 }
   0xf   :  { %312 = shalt.err (!%p309_p7)
}
  0x10   :  { %s340_s28 = smov 128   ;;  %s341_s29 = smov 8  }
  0x11   :  { %23 = dma.hbm_to_vmem [thread:$0]  %s422_s0, 384, %s18_s19, [#allocation3], %s340_s28, %s340_s28, %s341_s29  }
  0x12   :  { %335 = dma.done.wait [#allocation3], 384  }
  0x13   :  { %336 = vsyncadd [#allocation3], 4294966912  ;;  %v342_v0 = vmov 0   ;;  %vm52_vm0 = vcmask 195584   ;;  %v37_v1 = vld [vmem:[#allocation2] sm:$0xff]  ;;  %v38_v2 = vld [vmem:[#allocation2 + $0x8] sm:$0xff] }
  0x14   :  { %287 = vset.pattern.permute.xlu0 %v342_v0  ;;  %288 = vset.pattern.permute.xlu1 %v342_v0  ;;  %v270_v3 = vpack.c.bf16 %v38_v2, %v37_v1  ;;  %v35_v4 = vld [vmem:[%s423_s1] sm:$0xff]  ;;  %v39_v6 = vld [vmem:[#allocation2 + $0x10] sm:$0xff]  ;;  %v41_v7 = vld [vmem:[%s424_s2 + $0x8] sm:$0xf]  ;;  %v343_v9 = vmov 0.0|0.0   ;;  %vm344_vm1 = vmmov 0  }
  0x15   :  { %v40_v5 = vld [vmem:[%s424_s2] sm:$0xff]  ;;  %260 = vmatprep.mubr.msk.f32.mxu0 %vm52_vm0, %v35_v4  ;;  %v36_v8 = vld [vmem:[%s423_s1 + $0x8] sm:$0xf]  ;;  %274 = vmatprep.subr.bf16.mxu1 %v343_v9  ;;  %v345_v10 = vmov 0.0   ;;  %vm151_vm3 = vcmask 1043456   ;;  %vm346_vm5 = vmmov 1  }
  0x16   :  { %44 = vperm.xlu0 %287, %v40_v5   ;;  %271 = vmatprep.subr.bf16.mxu0 %v270_v3  ;;  %v141_v11 = vld [vmem:[%s426_s4] sm:$0xf]  ;;  %vm276_vm6 = vmpackc.low %vm151_vm3, %vm346_vm5  ;;  %vm147_vm7 = vcmask 97280   ;;  %s347_s4 = smov [#allocation5]  }
  0x17   :  { %273 = vmatpush3.bf16.msra.mxu0 %v270_v3  ;;  %267 = vmatprep.mubr.msk.f32.mxu1 %vm344_vm1, %v345_v10  ;;  %v140_v23 = vld [vmem:[%s425_s3] sm:$0xf]  ;;  %s233_s16 = sshll.u32 %s347_s4, 4  ;;  %s234_s16 = int_to_ptr.vmem [resolvable:$true] %s233_s16 }
  0x18   :  { %258 = vmatprep.subr.mxu0 %v39_v6  ;;  %144 = vperm.xlu1 %288, %v141_v11   ;;  %s313_s17 = scalar_lea.vmem %s234_s16, 64  ;;  %p318_p9 = scmp.lt.s32.totalorder %s234_s16, %s234_s16 }
  0x19   :  { %p314_p8 = scmp.ne.s32.totalorder %s234_s16, %s313_s17  ;;  %p319_p10 = scmp.lt.s32.totalorder %s313_s17, %s313_s17 }
  0x1a   :  { %49 = vperm.xlu0 %287, %v41_v7  }
  0x1b   :  { %259 = vmatpush3.msra.mxu0 %v39_v6  ;;  %p320_p11 = por %p319_p10, %p318_p9 }
  0x1c   :  { %261 = vmatmul.mubr.msk.f32.vlgmr.msra.gmra.mrb[0].mxu0 %vm52_vm0, %v36_v8 }
  0x1d   :  { %p321_p12 = pnand %p320_p11, %p314_p8 }
  0x95   :  { %v45_v12 = vpop.permute.xlu0 %44 }
  0x97   :  { %v145_v24 = vpop.permute.xlu1 %144 }
  0x99   :  { %v50_v13 = vpop.permute.xlu0 %49 }
  0xef   :  { %v262_v14 = vpop.f32.mrb[0].mxu0 }
  0xf0   :  { %v131_v15 = vadd.f32 %v262_v14, %v50_v13  ;;  %v125_v16 = vpop.f32.mrb[1].mxu0 }
  0xf1   :  { %v126_v17 = vadd.f32 %v125_v16, %v45_v12 }
  0xf2   :  { %vm135_vm2 = vcmp.gt.f32.partialorder %v131_v15, 0.0  ;;  %v137_v18 = vmul.f32 0.01, %v131_v15 }
  0xf3   :  { %vm134_vm4 = vcmp.gt.f32.partialorder %v126_v17, 0.0  ;;  %v136_v19 = vmul.f32 0.01, %v126_v17 }
  0xf4   :  { %v139_v20 = vsel %vm135_vm2, %v131_v15, %v137_v18 }
  0xf5   :  { %v138_v21 = vsel %vm134_vm4, %v126_v17, %v136_v19 }
  0xf6   :  { %v275_v22 = vpack.c.bf16 %v139_v20, %v138_v21 }
  0xf8   :  { %277 = vmatpush3.bf16.msk.msra.mxu1 %vm276_vm6, %v275_v22 }
  0xfb   :  { %268 = vmatmul.mubr.msk.f32.vlgmr.msra.gmra.mrb[0].mxu1 %vm147_vm7, %v140_v23 }
 0x1ce   :  { %v221_v25 = vpop.f32.mrb[0].mxu1 }
 0x1cf   :  { %v222_v26 = vadd.f32 %v221_v25, %v145_v24  ;;  %v269_v27 = vpop.f32.mrb[1].mxu1 }
 0x1d1   :  { %289 = vtanh.f32 %v222_v26 }
 0x1db   :  { %v290_v28 = vpop.eup %289 }
 0x1dc   :  { %226 = vst [vmem:[#allocation5] sm:$0xf] %v290_v28 }
 0x1dd   :  { %324 = shalt.err (!%p321_p12)
}
 0x1de   :  { %s325_s19 = scalar_lea.hbm %s427_s5, 64 }
 0x1df   :  { %p326_p13 = scmp.ne.s32.totalorder %s427_s5, %s325_s19  ;;  %p329_p0 = scmp.lt.u32.totalorder %s325_s19, %s427_s5 }
 0x1e1   :  { %p331_p1 = pnand %p329_p0, %p326_p13 }
 0x1e3   :  { %334 = shalt.err (!%p331_p1)
}
 0x1e4   :  { %236 = dma.vmem_to_hbm [thread:$0]  %s234_s16, 64, %s427_s5, [#allocation4]  }
 0x1e5   :  { %337 = dma.done.wait [#allocation4], 64  }
 0x1e6   :  { %338 = vsyncadd [#allocation4], 4294967232 }
 0x1e7   :  { %240 = vsyncpa [#allocation3], 1 }
 0x1e8   :  { %241 = vsyncpa [#allocation4], 1 }

</bundles_post_ra>
